<compile_context>
chip_gen: v7x
topology: tpu7x:2x2x1
jax: 0.10.0
libtpu: 0.0.40
codegen_flags: <defaults>
</compile_context>

<pallas_src>
import functools

import jax
import jax.numpy as jnp
from jax.experimental import pallas as pl
from jax.experimental.pallas import tpu as pltpu


def _shl_block_kernel(x_ref, w1_ref, w2_ref, out_ref, xcat_ref, hcat_ref, *,
                      img_h, lc_in, lc_mid, compute_dtype):
    """One grid step: `nb` whole images (M = nb*img_h rows) of the block.

    x_ref    : (M, W*C_in)   f32, lane-dense rows (lane index = x*C + c)
    w1_ref   : (3*W*C_in,  W*C_mid)  banded conv1 weight (ky blocks on K)
    w2_ref   : (3*W*C_mid, W*C_out)  banded conv2 weight
    out_ref  : (M, W*C_out)
    xcat_ref : (M, 3*W*C_in)  VMEM scratch  [x(y-1) | x(y) | x(y+1)]
    hcat_ref : (M, 3*W*C_mid) VMEM scratch  [h(y-1) | h(y) | h(y+1)]
    """
    x = x_ref[...]                       # f32; reused for the f32 shortcut add
    m = x.shape[0]

    def shifted(a):
        # Rows y-1 / y+1 of `a`, zeroed across image boundaries.  One-sublane
        # XLU roll + VPU mask -- no MXU shift matmuls, no padded scratch.
        row = jax.lax.broadcasted_iota(jnp.int32, a.shape, 0) % img_h
        up = jnp.where(row == 0, 0.0, pltpu.roll(a, shift=1, axis=0))
        dn = jnp.where(row == img_h - 1, 0.0,
                       pltpu.roll(a, shift=m - 1, axis=0))
        return up, dn

    # ---- conv1 (3x3, pad 1) as one banded matmul over K = 3*W*C_in ---------
    x_up, x_dn = shifted(x)
    xcat_ref[:, 0:lc_in] = x_up.astype(compute_dtype)
    xcat_ref[:, lc_in:2 * lc_in] = x.astype(compute_dtype)
    xcat_ref[:, 2 * lc_in:3 * lc_in] = x_dn.astype(compute_dtype)
    h = jnp.maximum(
        jnp.dot(xcat_ref[...], w1_ref[...], preferred_element_type=jnp.float32),
        0.0)                                              # fused ReLU, f32

    # ---- conv2 (3x3, pad 1): same structure, single fused MXU pass ---------
    h_up, h_dn = shifted(h)
    hcat_ref[:, 0:lc_mid] = h_up.astype(compute_dtype)
    hcat_ref[:, lc_mid:2 * lc_mid] = h.astype(compute_dtype)
    hcat_ref[:, 2 * lc_mid:3 * lc_mid] = h_dn.astype(compute_dtype)
    y = jnp.dot(hcat_ref[...], w2_ref[...], preferred_element_type=jnp.float32)

    # ---- identity shortcut in f32 (independent of compute_dtype) -----------
    out_ref[...] = (y + x).astype(out_ref.dtype)


def _toeplitz_conv_weight(w_oihw, W):
    """OIHW 3x3 conv weight -> (3, W*C_in, W*C_out) banded matrices (one / ky).

    W_ky[xin*C_in + c, x*C_out + o] = w[o, c, ky, xin - x + 1] if |xin-x| <= 1
    else 0, i.e. the W-axis conv (with zero padding) expressed as a matmul.
    """
    C_out, C_in, KH, KW = w_oihw.shape
    w_k = jnp.transpose(w_oihw, (2, 3, 1, 0))          # (ky, kx, C_in, C_out)
    xin = jnp.arange(W)[:, None]                       # input column
    xout = jnp.arange(W)[None, :]                      # output column
    kx = xin - xout + 1                                # (W, W)
    valid = (kx >= 0) & (kx < KW)
    kx_c = jnp.clip(kx, 0, KW - 1)
    big = w_k[:, kx_c, :, :]                           # (ky, Win, Wout, Cin, Cout)
    big = jnp.where(valid[None, :, :, None, None], big, 0.0)
    big = jnp.transpose(big, (0, 1, 3, 2, 4))          # (ky, Win, Cin, Wout, Cout)
    return big.reshape(KH, W * C_in, W * C_out)


def shl_block_forward(x_nchw, w1_oihw, w2_oihw, *, batch_block=None,
                      compute_dtype=jnp.bfloat16):
    """x_nchw: (N, C, H, W) float32.  Weights in PyTorch OIHW layout."""
    N, C_in, H, W = x_nchw.shape
    C_mid = w1_oihw.shape[0]
    C_out = w2_oihw.shape[0]
    assert w1_oihw.shape[1] == C_in and w2_oihw.shape[1] == C_mid
    assert C_out == C_in, "identity shortcut requires in_planes == planes"

    if batch_block is None:
        # Fill the MXU (target a few hundred rows / block) but keep >= 2 grid
        # steps when N allows, so v7x's two TensorCores / the DMA pipeline
        # have parallel work.
        nb = max(1, min(N, 512 // H if H < 512 else 1))
        if N >= 2:
            nb = min(nb, max(1, N // 2))
        while N % nb:
            nb -= 1
    else:
        nb = batch_block
    assert N % nb == 0
    M = nb * H                        # matmul rows per grid step (whole images)
    LC_in, LC_mid, LC_out = W * C_in, W * C_mid, W * C_out

    # ---- host-side layout prep: NCHW -> lane-dense rows (n,y) x (x,c) ------
    # x is passed ONCE, in f32 (no 3x-duplicated x_cat); shifts are in-kernel.
    x_rows = jnp.transpose(x_nchw, (0, 2, 3, 1)).reshape(N * H, LC_in)
    x_rows = x_rows.astype(jnp.float32)

    # ---- banded conv weights (W padding baked into the zero band) ----------
    w1_cat = _toeplitz_conv_weight(w1_oihw, W).reshape(
        3 * LC_in, LC_mid).astype(compute_dtype)
    w2_cat = _toeplitz_conv_weight(w2_oihw, W).reshape(
        3 * LC_mid, LC_out).astype(compute_dtype)

    kernel = functools.partial(_shl_block_kernel, img_h=H, lc_in=LC_in,
                               lc_mid=LC_mid, compute_dtype=compute_dtype)

    itemsize_c = jnp.dtype(compute_dtype).itemsize
    lc_max = max(LC_in, LC_mid, LC_out)
    vmem_est = (2 * M * LC_in * 4                       # x block (double buf)
                + 2 * M * LC_out * 4                    # out block (double buf)
                + 3 * LC_in * LC_mid * itemsize_c       # w1 (single buffered)
                + 3 * LC_mid * LC_out * itemsize_c      # w2 (single buffered)
                + M * 3 * LC_in * itemsize_c            # xcat scratch
                + M * 3 * LC_mid * itemsize_c           # hcat scratch
                + 8 * M * lc_max * 4)                   # f32 temporaries
    vmem_limit = int(min(64 * 1024 * 1024, max(4 * 1024 * 1024, 2 * vmem_est)))

    cost = pl.CostEstimate(
        flops=int(2 * N * H * (3 * LC_in * LC_mid + 3 * LC_mid * LC_out)),
        transcendentals=0,
        bytes_accessed=int(N * H * (LC_in + LC_out) * 4
                           + (3 * LC_in * LC_mid + 3 * LC_mid * LC_out)
                           * itemsize_c))

    out = pl.pallas_call(
        kernel,
        out_shape=jax.ShapeDtypeStruct((N * H, LC_out), x_nchw.dtype),
        grid_spec=pltpu.PrefetchScalarGridSpec(
            num_scalar_prefetch=0,
            grid=(N // nb,),
            in_specs=[
                pl.BlockSpec((M, LC_in), lambda i: (i, 0)),
                # Grid-invariant weight slabs: single-buffered to save VMEM.
                pl.BlockSpec((3 * LC_in, LC_mid), lambda i: (0, 0),
                             pipeline_mode=pl.Buffered(1)),
                pl.BlockSpec((3 * LC_mid, LC_out), lambda i: (0, 0),
                             pipeline_mode=pl.Buffered(1)),
            ],
            out_specs=pl.BlockSpec((M, LC_out), lambda i: (i, 0)),
            scratch_shapes=[
                pltpu.VMEM((M, 3 * LC_in), compute_dtype),
                pltpu.VMEM((M, 3 * LC_mid), compute_dtype),
            ],
        ),
        compiler_params=pltpu.CompilerParams(
            dimension_semantics=("parallel",),
            vmem_limit_bytes=vmem_limit),
        cost_estimate=cost,
    )(x_rows, w1_cat, w2_cat)

    # (N*H, W*C_out) -> NCHW
    return jnp.transpose(out.reshape(N, H, W, C_out), (0, 3, 1, 2))


def _reference_forward(x, w1, w2):
    """Pure-JAX reference matching the PyTorch module (NCHW / OIHW)."""
    dn = ("NCHW", "OIHW", "NCHW")
    conv1 = jax.lax.conv_general_dilated(x, w1, window_strides=(1, 1),
                                         padding=((1, 1), (1, 1)),
                                         dimension_numbers=dn)
    h = jnp.maximum(conv1, 0.0)
    conv2 = jax.lax.conv_general_dilated(h, w2, window_strides=(1, 1),
                                         padding=((1, 1), (1, 1)),
                                         dimension_numbers=dn)
    return conv2 + x  # identity shortcut


if __name__ == "__main__":
    # Small shapes: batch=2, in_planes=planes=8, spatial 16x16, stride=1.
    # (W * C = 128 -> fully lane-dense rows; grid = 2 blocks of 1 image.)
    N, C, H, W = 2, 8, 16, 16

    key = jax.random.PRNGKey(0)
    kx, k1, k2 = jax.random.split(key, 3)
    x = jax.random.normal(kx, (N, C, H, W), dtype=jnp.float32)
    # conv1.weight: (planes, in_planes, 3, 3); conv2.weight: (planes, planes, 3, 3)
    # zero_init=False -> non-trivial conv2 weights.
    w1 = 0.1 * jax.random.normal(k1, (C, C, 3, 3), dtype=jnp.float32)
    w2 = 0.1 * jax.random.normal(k2, (C, C, 3, 3), dtype=jnp.float32)

    ref = _reference_forward(x, w1, w2)

    # f32-operand path: tight tolerance vs. the XLA conv reference.
    out_f32 = jax.block_until_ready(
        shl_block_forward(x, w1, w2, compute_dtype=jnp.float32))
    assert out_f32.shape == ref.shape == (N, C, H, W)
    assert jnp.allclose(out_f32, ref, atol=1e-4, rtol=1e-4), "f32 mismatch"

    # Default bf16-operand path (f32 accumulation + f32 residual): bf16
    # operand rounding bounds the error well below 5e-2 at these magnitudes.
    out_bf16 = jax.block_until_ready(shl_block_forward(x, w1, w2))
    assert out_bf16.shape == ref.shape
    assert jnp.allclose(out_bf16, ref, atol=5e-2, rtol=5e-2), "bf16 mismatch"

    print("KERNEL_OK")
</pallas_src>

<mosaic_0001>
module attributes {stable_mosaic.version = 11 : i64} {
  func.func @_shl_block_kernel(%arg0: i32, %arg1: memref<16x128xf32, #tpu.memory_space<vmem>>, %arg2: memref<384x128xf32, #tpu.memory_space<vmem>>, %arg3: memref<384x128xf32, #tpu.memory_space<vmem>>, %arg4: memref<16x128xf32, #tpu.memory_space<vmem>>, %arg5: memref<16x384xf32, #tpu.memory_space<vmem>>, %arg6: memref<16x384xf32, #tpu.memory_space<vmem>>) attributes {dimension_semantics = [#tpu.dimension_semantics<parallel>], iteration_bounds = array<i64: 2>, scalar_prefetch = 0 : i64, scratch_operands = 2 : i64, tpu.core_type = #tpu.core_type<tc>, window_params = [{transform_indices = @transform_0, window_bounds = array<i64: 16, 128>}, {pipeline_mode = #tpu.pipeline_mode<synchronous>, transform_indices = @transform_1, window_bounds = array<i64: 384, 128>}, {pipeline_mode = #tpu.pipeline_mode<synchronous>, transform_indices = @transform_2, window_bounds = array<i64: 384, 128>}, {transform_indices = @transform_3, window_bounds = array<i64: 16, 128>}]} {
    %c0 = arith.constant 0 : index
    %c0_0 = arith.constant 0 : index
    %0 = vector.load %arg1[%c0, %c0_0] : memref<16x128xf32, #tpu.memory_space<vmem>>, vector<16x128xf32>
    %1 = tpu.iota {dimensions = array<i32: 0>} : vector<16x128xi32>
    %c16_i32 = arith.constant 16 : i32
    %c0_i32 = arith.constant 0 : i32
    %2 = arith.cmpi eq, %c16_i32, %c0_i32 : i32
    %c1_i32 = arith.constant 1 : i32
    %3 = arith.select %2, %c1_i32, %c16_i32 : i32
    %4 = vector.broadcast %3 : i32 to vector<16x128xi32>
    %5 = arith.remsi %1, %4 : vector<16x128xi32>
    %c0_i32_1 = arith.constant 0 : i32
    %6 = vector.broadcast %c0_i32_1 : i32 to vector<16x128xi32>
    %7 = arith.cmpi ne, %5, %6 : vector<16x128xi32>
    %c0_i32_2 = arith.constant 0 : i32
    %8 = vector.broadcast %c0_i32_2 : i32 to vector<16x128xi32>
    %9 = arith.cmpi slt, %5, %8 : vector<16x128xi32>
    %c0_i32_3 = arith.constant 0 : i32
    %10 = arith.cmpi slt, %3, %c0_i32_3 : i32
    %11 = vector.broadcast %10 : i1 to vector<16x128xi1>
    %12 = vector.broadcast %11 : vector<16x128xi1> to vector<16x128xi1>
    %13 = arith.xori %9, %12 : vector<16x128xi1>
    %14 = arith.andi %13, %7 : vector<16x128xi1>
    %15 = vector.broadcast %3 : i32 to vector<16x128xi32>
    %16 = arith.addi %5, %15 : vector<16x128xi32>
    %17 = arith.select %14, %16, %5 : vector<16x128xi1>, vector<16x128xi32>
    %c0_i32_4 = arith.constant 0 : i32
    %18 = vector.broadcast %c0_i32_4 : i32 to vector<16x128xi32>
    %19 = arith.cmpi eq, %17, %18 : vector<16x128xi32>
    %c1_i32_5 = arith.constant 1 : i32
    %20 = tpu.dynamic_rotate %0 by %c1_i32_5 dim 0 : vector<16x128xf32>, i32 -> vector<16x128xf32>
    %cst = arith.constant 0.000000e+00 : f32
    %21 = vector.broadcast %cst : f32 to vector<16x128xf32>
    %22 = arith.select %19, %21, %20 : vector<16x128xi1>, vector<16x128xf32>
    %c15_i32 = arith.constant 15 : i32
    %23 = vector.broadcast %c15_i32 : i32 to vector<16x128xi32>
    %24 = arith.cmpi eq, %17, %23 : vector<16x128xi32>
    %c15_i32_6 = arith.constant 15 : i32
    %25 = tpu.dynamic_rotate %0 by %c15_i32_6 dim 0 : vector<16x128xf32>, i32 -> vector<16x128xf32>
    %cst_7 = arith.constant 0.000000e+00 : f32
    %26 = vector.broadcast %cst_7 : f32 to vector<16x128xf32>
    %27 = arith.select %24, %26, %25 : vector<16x128xi1>, vector<16x128xf32>
    %c0_8 = arith.constant 0 : index
    %c0_9 = arith.constant 0 : index
    %28 = vector.load %arg5[%c0_8, %c0_9] : memref<16x384xf32, #tpu.memory_space<vmem>>, vector<16x128xf32>
    tpu.vector_store %arg5[%c0_8, %c0_9], %22 {strides = array<i32>} : memref<16x384xf32, #tpu.memory_space<vmem>>, vector<16x128xf32>,
    %c0_10 = arith.constant 0 : index
    %c128 = arith.constant 128 : index
    %29 = vector.load %arg5[%c0_10, %c128] : memref<16x384xf32, #tpu.memory_space<vmem>>, vector<16x128xf32>
    tpu.vector_store %arg5[%c0_10, %c128], %0 {strides = array<i32>} : memref<16x384xf32, #tpu.memory_space<vmem>>, vector<16x128xf32>,
    %c0_11 = arith.constant 0 : index
    %c256 = arith.constant 256 : index
    %30 = vector.load %arg5[%c0_11, %c256] : memref<16x384xf32, #tpu.memory_space<vmem>>, vector<16x128xf32>
    tpu.vector_store %arg5[%c0_11, %c256], %27 {strides = array<i32>} : memref<16x384xf32, #tpu.memory_space<vmem>>, vector<16x128xf32>,
    %c0_12 = arith.constant 0 : index
    %c0_13 = arith.constant 0 : index
    %31 = vector.load %arg5[%c0_12, %c0_13] : memref<16x384xf32, #tpu.memory_space<vmem>>, vector<16x384xf32>
    %c0_14 = arith.constant 0 : index
    %c0_15 = arith.constant 0 : index
    %32 = vector.load %arg2[%c0_14, %c0_15] : memref<384x128xf32, #tpu.memory_space<vmem>>, vector<384x128xf32>
    %cst_16 = arith.constant dense<0.000000e+00> : vector<16x128xf32>
    %33 = tpu.matmul %31, %32, %cst_16 {dimension_numbers = #tpu.dot_dimension_numbers<[1], [0], [0], [1], [0, 0, 1, 1], [], []>} : vector<16x384xf32>, vector<384x128xf32>, vector<16x128xf32> -> vector<16x128xf32>
    %cst_17 = arith.constant 0.000000e+00 : f32
    %34 = vector.broadcast %cst_17 : f32 to vector<16x128xf32>
    %35 = arith.maximumf %33, %34 : vector<16x128xf32>
    %36 = tpu.iota {dimensions = array<i32: 0>} : vector<16x128xi32>
    %c16_i32_18 = arith.constant 16 : i32
    %c0_i32_19 = arith.constant 0 : i32
    %37 = arith.cmpi eq, %c16_i32_18, %c0_i32_19 : i32
    %c1_i32_20 = arith.constant 1 : i32
    %38 = arith.select %37, %c1_i32_20, %c16_i32_18 : i32
    %39 = vector.broadcast %38 : i32 to vector<16x128xi32>
    %40 = arith.remsi %36, %39 : vector<16x128xi32>
    %c0_i32_21 = arith.constant 0 : i32
    %41 = vector.broadcast %c0_i32_21 : i32 to vector<16x128xi32>
    %42 = arith.cmpi ne, %40, %41 : vector<16x128xi32>
    %c0_i32_22 = arith.constant 0 : i32
    %43 = vector.broadcast %c0_i32_22 : i32 to vector<16x128xi32>
    %44 = arith.cmpi slt, %40, %43 : vector<16x128xi32>
    %c0_i32_23 = arith.constant 0 : i32
    %45 = arith.cmpi slt, %38, %c0_i32_23 : i32
    %46 = vector.broadcast %45 : i1 to vector<16x128xi1>
    %47 = vector.broadcast %46 : vector<16x128xi1> to vector<16x128xi1>
    %48 = arith.xori %44, %47 : vector<16x128xi1>
    %49 = arith.andi %48, %42 : vector<16x128xi1>
    %50 = vector.broadcast %38 : i32 to vector<16x128xi32>
    %51 = arith.addi %40, %50 : vector<16x128xi32>
    %52 = arith.select %49, %51, %40 : vector<16x128xi1>, vector<16x128xi32>
    %c0_i32_24 = arith.constant 0 : i32
    %53 = vector.broadcast %c0_i32_24 : i32 to vector<16x128xi32>
    %54 = arith.cmpi eq, %52, %53 : vector<16x128xi32>
    %c1_i32_25 = arith.constant 1 : i32
    %55 = tpu.dynamic_rotate %35 by %c1_i32_25 dim 0 : vector<16x128xf32>, i32 -> vector<16x128xf32>
    %cst_26 = arith.constant 0.000000e+00 : f32
    %56 = vector.broadcast %cst_26 : f32 to vector<16x128xf32>
    %57 = arith.select %54, %56, %55 : vector<16x128xi1>, vector<16x128xf32>
    %c15_i32_27 = arith.constant 15 : i32
    %58 = vector.broadcast %c15_i32_27 : i32 to vector<16x128xi32>
    %59 = arith.cmpi eq, %52, %58 : vector<16x128xi32>
    %c15_i32_28 = arith.constant 15 : i32
    %60 = tpu.dynamic_rotate %35 by %c15_i32_28 dim 0 : vector<16x128xf32>, i32 -> vector<16x128xf32>
    %cst_29 = arith.constant 0.000000e+00 : f32
    %61 = vector.broadcast %cst_29 : f32 to vector<16x128xf32>
    %62 = arith.select %59, %61, %60 : vector<16x128xi1>, vector<16x128xf32>
    %c0_30 = arith.constant 0 : index
    %c0_31 = arith.constant 0 : index
    %63 = vector.load %arg6[%c0_30, %c0_31] : memref<16x384xf32, #tpu.memory_space<vmem>>, vector<16x128xf32>
    tpu.vector_store %arg6[%c0_30, %c0_31], %57 {strides = array<i32>} : memref<16x384xf32, #tpu.memory_space<vmem>>, vector<16x128xf32>,
    %c0_32 = arith.constant 0 : index
    %c128_33 = arith.constant 128 : index
    %64 = vector.load %arg6[%c0_32, %c128_33] : memref<16x384xf32, #tpu.memory_space<vmem>>, vector<16x128xf32>
    tpu.vector_store %arg6[%c0_32, %c128_33], %35 {strides = array<i32>} : memref<16x384xf32, #tpu.memory_space<vmem>>, vector<16x128xf32>,
    %c0_34 = arith.constant 0 : index
    %c256_35 = arith.constant 256 : index
    %65 = vector.load %arg6[%c0_34, %c256_35] : memref<16x384xf32, #tpu.memory_space<vmem>>, vector<16x128xf32>
    tpu.vector_store %arg6[%c0_34, %c256_35], %62 {strides = array<i32>} : memref<16x384xf32, #tpu.memory_space<vmem>>, vector<16x128xf32>,
    %c0_36 = arith.constant 0 : index
    %c0_37 = arith.constant 0 : index
    %66 = vector.load %arg6[%c0_36, %c0_37] : memref<16x384xf32, #tpu.memory_space<vmem>>, vector<16x384xf32>
    %c0_38 = arith.constant 0 : index
    %c0_39 = arith.constant 0 : index
    %67 = vector.load %arg3[%c0_38, %c0_39] : memref<384x128xf32, #tpu.memory_space<vmem>>, vector<384x128xf32>
    %cst_40 = arith.constant dense<0.000000e+00> : vector<16x128xf32>
    %68 = tpu.matmul %66, %67, %cst_40 {dimension_numbers = #tpu.dot_dimension_numbers<[1], [0], [0], [1], [0, 0, 1, 1], [], []>} : vector<16x384xf32>, vector<384x128xf32>, vector<16x128xf32> -> vector<16x128xf32>
    %69 = arith.addf %68, %0 : vector<16x128xf32>
    %c0_41 = arith.constant 0 : index
    %c0_42 = arith.constant 0 : index
    %70 = vector.load %arg4[%c0_41, %c0_42] : memref<16x128xf32, #tpu.memory_space<vmem>>, vector<16x128xf32>
    tpu.vector_store %arg4[%c0_41, %c0_42], %69 {strides = array<i32>} : memref<16x128xf32, #tpu.memory_space<vmem>>, vector<16x128xf32>,
    return
  }
  func.func @transform_0(%arg0: i32) -> (i32, i32) {
    %c0_i32 = arith.constant 0 : i32
    %c0_i32_0 = arith.constant 0 : i32
    return %arg0, %c0_i32 : i32, i32
  }
  func.func @transform_1(%arg0: i32) -> (i32, i32) {
    %c0_i32 = arith.constant 0 : i32
    %c0_i32_0 = arith.constant 0 : i32
    %c0_i32_1 = arith.constant 0 : i32
    return %c0_i32, %c0_i32_0 : i32, i32
  }
  func.func @transform_2(%arg0: i32) -> (i32, i32) {
    %c0_i32 = arith.constant 0 : i32
    %c0_i32_0 = arith.constant 0 : i32
    %c0_i32_1 = arith.constant 0 : i32
    return %c0_i32, %c0_i32_0 : i32, i32
  }
  func.func @transform_3(%arg0: i32) -> (i32, i32) {
    %c0_i32 = arith.constant 0 : i32
    %c0_i32_0 = arith.constant 0 : i32
    return %arg0, %c0_i32 : i32, i32
  }
}

</mosaic_0001>

<bundles_post_ra>
// kernel: tpu_custom_call.1
= control target key start
LH: loop header
LB: loop body
LE: loop exit
PB: predicated region body
PF: predicated region fallthrough
CT: control target
= control target key end

     0   :  { %8 = vsyncpa [#allocation5], 0  ;;  %s1714_s0 = inlined_call_operand.hbm [shape: f32[32,128], index: 0, kind: input, shape index: {}]   ;;  %s1715_s1 = inlined_call_operand.hbm [shape: f32[384,128], index: 1, kind: input, shape index: {}]   ;;  %s1716_s2 = inlined_call_operand.hbm [shape: f32[384,128], index: 2, kind: input, shape index: {}]   ;;  %s1717_s3 = inlined_call_operand.hbm [shape: f32[32,128], index: 3, kind: output, shape index: {}]  }
   0x1   :  { %10 = vsyncpa [#allocation5 + $0x1], 0 }
   0x2   :  { %11 = vsyncpa [#allocation8], 0 }
   0x3   :  { %12 = vsyncpa [#allocation6], 0 }
   0x4   :  { %14 = vsyncpa [#allocation6 + $0x1], 0  ;;  %s1406_s12 = smov 0   ;;  %s1408_s13 = smov 0  }
   0x5   :  { %s1410_s14 = smov 0   ;;  %s1412_s15 = smov 0  }
   0x6 LB: > { %s1427_s16 = sadd.s32 4294967295, %s1376_s15   ;;  %s809_s17 = sadd.s32 4294967294, %s1376_s15   ;;  %s1376_s15 = sphi %s1412_s15, %s1741_s15   ;;  %s1372_s14 = sphi %s1410_s14, %s1740_s14   ;;  %s1368_s13 = sphi %s1408_s13, %s1739_s13   ;;  %s1364_s12 = sphi %s1406_s12, %s1738_s12  }
   0x7   : > { %p40_p0 = scmp.ne.s32.totalorder %s1368_s13, %s1364_s12  ;;  %p1718_p1 = scmp.eq.s32.totalorder %s1427_s16, 0 }
   0x8   : > { %p112_p3 = scmp.eq.s32.totalorder %s809_s17, 1  ;;  %p810_p5 = scmp.ge.s32.totalorder %s1376_s15, 1 }
   0x9   : > { %p1436_p4 = por %p1718_p1, %p40_p0  ;;  %p119_p7 = scmp.lt.s32.totalorder %s1376_s15, 3 }
   0xa   : > { %p1441_p6 = por %p112_p3, %p40_p0  ;;  %s1378_s21 = smov [#allocation7]  }
   0xb   : > { %s1721_s18 = scalar_select %p1436_p4, 1, 0 }
   0xc   : > { %s1722_s19 = scalar_select %p1441_p6, 1, 0 }
   0xd   : > { %p1446_p8 = pnand %p810_p5, %p119_p7  ;;  %s131_s22 = sshll.u32 %s1378_s21, 4  ;;  %s1450_s22 = int_to_ptr.vmem [resolvable:$true] %s131_s22 }
   0xe   : > { %s1379_s24 = smov [#allocation9]   ;;  %s1220_s28 = scalar_lea.hbm %s1715_s1, 6144 }
   0xf   : > { %p1159_p9 = pneg %p1446_p8  ;;  %s144_s25 = sshll.u32 %s1379_s24, 4  ;;  %s1461_s25 = int_to_ptr.vmem [resolvable:$true] %s144_s25 }
  0x10   : > { %p1221_p12 = scmp.ne.s32.totalorder %s1715_s1, %s1220_s28  ;;  %p1227_p5 = scmp.lt.u32.totalorder %s1220_s28, %s1715_s1 }
  0x11   : > { %p1457_p11 = pnand %p1159_p9, %p1718_p1 }
  0x13   : > { %p1222_p13 = pneg %p1457_p11 }
  0x15   : > { %p1223_p0 = pnand %p1222_p13, %p1221_p12 }
  0x17   : > { %p1224_p3 = pneg %p1223_p0 }
  0x19   : > { %p1229_p7 = pnand %p1227_p5, %p1224_p3 }
  0x1b   : > { %1232 = shalt.err (!%p1229_p7)
}
  0x1c   : > { %s1233_s6 = scalar_lea.vmem %s1450_s22, 6144  ;;  %p1241_p2 = scmp.lt.s32.totalorder %s1450_s22, %s1450_s22 }
  0x1d   : > { %p1234_p9 = scmp.ne.s32.totalorder %s1450_s22, %s1233_s6  ;;  %p1242_p12 = scmp.lt.s32.totalorder %s1233_s6, %s1233_s6 }
  0x1f   : > { %p1236_p10 = pnand %p1234_p9, %p1222_p13  ;;  %p1243_p0 = por %p1242_p12, %p1241_p2 }
  0x21   : > { %p1237_p1 = pneg %p1236_p10 }
  0x23   : > { %p1244_p6 = pnand %p1243_p0, %p1237_p1 }
  0x25   : > { %1247 = shalt.err (!%p1244_p6)
}
  0x26   : > { %s1380_s7 = smov 128   ;;  %s1381_s8 = smov 8  }
  0x27   : > { %1162 = dma.hbm_to_vmem [thread:$0]  (!%p1457_p11), %s1715_s1, 6144, %s1450_s22, [#allocation8], %s1380_s7, %s1380_s7, %s1381_s8  }
  0x28   : > { %s1248_s21 = scalar_lea.hbm %s1716_s2, 6144 }
  0x29   : > { %p1249_p1 = scmp.ne.s32.totalorder %s1716_s2, %s1248_s21  ;;  %p1255_p10 = scmp.lt.u32.totalorder %s1248_s21, %s1716_s2 }
  0x2b   : > { %p1251_p2 = pnand %p1249_p1, %p1222_p13 }
  0x2d   : > { %p1252_p6 = pneg %p1251_p2 }
  0x2f   : > { %p1257_p3 = pnand %p1255_p10, %p1252_p6 }
  0x31   : > { %1260 = shalt.err (!%p1257_p3)
}
  0x32   : > { %s1261_s22 = scalar_lea.vmem %s1461_s25, 6144  ;;  %p1269_p12 = scmp.lt.s32.totalorder %s1461_s25, %s1461_s25 }
  0x33   : > { %p1262_p5 = scmp.ne.s32.totalorder %s1461_s25, %s1261_s22  ;;  %p1270_p0 = scmp.lt.s32.totalorder %s1261_s22, %s1261_s22 }
  0x35   : > { %p1264_p7 = pnand %p1262_p5, %p1222_p13  ;;  %p1271_p1 = por %p1270_p0, %p1269_p12 }
  0x37   : > { %p1265_p9 = pneg %p1264_p7 }
  0x39   : > { %p1272_p2 = pnand %p1271_p1, %p1265_p9 }
  0x3b   : > { %1275 = shalt.err (!%p1272_p2)
}
  0x3c   : > { %1165 = dma.hbm_to_vmem [thread:$0]  (!%p1457_p11), %s1716_s2, 6144, %s1461_s25, [#allocation8], %s1380_s7, %s1380_s7, %s1381_s8  }
  0x3d   : > { %s1522_s23 = sadd.s32 1, %s1376_s15   ;;  %s27_s4 = sadd.s32 1, %s1372_s14 }
  0x3e   : > { %s24_s5 = ssub.s32 %s1376_s15, %s1522_s23  ;;  %p34_p13 = scmp.ne.s32.totalorder %s1372_s14, %s1368_s13 }
  0x3f   : > { %p25_p6 = scmp.eq.s32.totalorder %s24_s5, 0  ;;  %p35_p10 = scmp.eq.s32.totalorder %s1376_s15, 0 }
  0x40   : > { %p1725_p3 = scmp.eq.s32.totalorder %s1427_s16, 1  ;;  %p1176_p7 = scmp.lt.s32.totalorder %s1376_s15, 2 }
  0x41   : > { %s1538_s9 = scalar_select %p25_p6, %s1372_s14, %s27_s4  }
  0x42   : > { %p1532_p5 = por %p1725_p3, %p34_p13  ;;  %p36_p9 = por %p35_p10, %p34_p13 }
  0x43   : > { %s158_s10 = sand.u32 1, %s1372_s14   ;;  %s827_s25 = sshll.u32 %s1376_s15, 8 }
  0x44   : > { %s1726_s6 = scalar_select %p1532_p5, 1, 0 }
  0x45   : > { %s814_s11 = sshll.u32 %s158_s10, 4  ;;  %s1545_s24 = scalar_lea.hbm %s1714_s0, %s827_s25 }
  0x46   : > { %s162_s26 = scalar_lea.vmem [#allocation4], %s814_s11  ;;  %p1549_p11 = pnand %p1176_p7, %p36_p9 }
  0x47   : > { %s169_s27 = sshll.u32 %s162_s26, 4  ;;  %s1553_s22 = scalar_lea.sflag [#allocation5], %s158_s10  ;;  %s1547_s27 = int_to_ptr.vmem [resolvable:$true] %s169_s27 }
  0x48   : > { %s1276_s29 = scalar_lea.hbm %s1545_s24, 256  ;;  %p1278_p0 = pneg %p1549_p11 }
  0x49   : > { %p1277_p12 = scmp.ne.s32.totalorder %s1545_s24, %s1276_s29  ;;  %s1281_s5 = scalar_lea.hbm %s1714_s0, 512 }
  0x4a   : > { %p1282_p13 = scmp.lt.u32.totalorder %s1545_s24, %s1714_s0  ;;  %p1283_p6 = scmp.lt.u32.totalorder %s1281_s5, %s1276_s29 }
  0x4b   : > { %p1279_p1 = pnand %p1278_p0, %p1277_p12  ;;  %p1285_p3 = scmp.lt.u32.totalorder %s1276_s29, %s1545_s24 }
  0x4c   : > { %p1284_p10 = por %p1283_p6, %p1282_p13 }
  0x4d   : > { %p1280_p2 = pneg %p1279_p1 }
  0x4e   : > { %p1286_p7 = por %p1285_p3, %p1284_p10 }
  0x50   : > { %p1287_p9 = pnand %p1286_p7, %p1280_p2 }
  0x52   : > { %1290 = shalt.err (!%p1287_p9)
}
  0x53   : > { %s1291_s10 = scalar_lea.vmem %s1547_s27, 256  ;;  %s1382_s17 = smov [#allocation4]  }
  0x54   : > { %p1292_p12 = scmp.ne.s32.totalorder %s1547_s27, %s1291_s10  ;;  %s1296_s21 = sshll.u32 %s1382_s17, 4  ;;  %s1297_s21 = int_to_ptr.vmem [resolvable:$false] %s1296_s21 }
  0x55   : > { %s1298_s26 = scalar_lea.vmem %s1297_s21, 512  ;;  %p1299_p4 = scmp.lt.s32.totalorder %s1547_s27, %s1297_s21 }
  0x56   : > { %p1294_p1 = pnand %p1292_p12, %p1278_p0  ;;  %p1300_p13 = scmp.lt.s32.totalorder %s1298_s26, %s1291_s10 }
  0x58   : > { %p1295_p5 = pneg %p1294_p1  ;;  %p1301_p6 = por %p1300_p13, %p1299_p4 }
  0x5a   : > { %p1302_p10 = pnand %p1301_p6, %p1295_p5 }
  0x5c   : > { %1305 = shalt.err (!%p1302_p10)
}
  0x5d   : > { %1169 = dma.hbm_to_vmem [thread:$0]  (!%p1549_p11), %s1545_s24, 256, %s1547_s27, %s1553_s22, %s1380_s7, %s1380_s7, %s1381_s8  }
  0x5e   : > { %181 = sbr.rel (%p1446_p8) target bundleno = 604 (0x25c), region = 32  ;;  %s1587_s29 = sand.u32 (!%p1446_p8), 1, %s1368_s13  }
  0x5f   : > { %s818_s30 = sshll.u32 (!%p1446_p8), %s1587_s29, 4  ;;  %s184_s4 = scalar_lea.sflag (!%p1446_p8), [#allocation5], %s1587_s29 }
  0x60   : > { %s1593_s28 = scalar_lea.vmem (!%p1446_p8), [#allocation4], %s818_s30  ;;  %p1728_p4 = scmp.ne.s32.totalorder (!%p1446_p8), %s1721_s18, 0 }
  0x65   : > { %1351 = dma.done.wait (%p1728_p4), %s184_s4, 256  }
  0x66   : > { %1353 = vsyncadd (%p1728_p4), %s184_s4, 4294967040  ;;  %p1729_p5 = scmp.eq.s32.totalorder %s1427_s16, 0 }
  0x68   : > { %1355 = dma.done.wait (%p1729_p5), [#allocation8], 12288   ;;  %p1730_p8 = pmov %p1729_p5 }
  0x69   : > { %v222_v0 = vlaneseq  ;;  %v295_v5 = vld [vmem:[#allocation7 + $0x80] sm:$0xff]  ;;  %v296_v6 = vld [vmem:[#allocation7 + $0x88] sm:$0xff]  ;;  %v297_v14 = vld [vmem:[#allocation7 + $0x90] sm:$0xff]  ;;  %s217_s18 = scalar_lea.vmem [#allocation10], %s818_s30  ;;  %s828_s7 = sshll.u32 %s1427_s16, 8 }
  0x6a   : > { %1357 = vsyncadd (%p1730_p8), [#allocation8], 4294955008  ;;  %v279_v7 = vld [vmem:[#allocation7] sm:$0xff]  ;;  %v1019_v8 = vpack.c.bf16 %v296_v6, %v295_v5  ;;  %v280_v9 = vld [vmem:[#allocation7 + $0x8] sm:$0xff]  ;;  %s717_s20 = sshll.u32 %s217_s18, 4  ;;  %s1670_s27 = scalar_lea.hbm %s1717_s3, %s828_s7  ;;  %s1664_s20 = int_to_ptr.vmem [resolvable:$true] %s717_s20 }
  0x6b   : > { %v1603_v1 = vshrl.u32 %v222_v0, 7  ;;  %v311_v10 = vld [vmem:[#allocation7 + $0x100] sm:$0xff]  ;;  %v312_v11 = vld [vmem:[#allocation7 + $0x108] sm:$0xff]  ;;  %v1021_v12 = vpack.c.bf16 %v280_v9, %v279_v7  ;;  %v298_v15 = vld [vmem:[#allocation7 + $0x98] sm:$0xff]  ;;  %s704_s22 = scalar_lea.sflag [#allocation6], %s1587_s29  ;;  %s1306_s5 = scalar_lea.vmem %s1664_s20, 256 }
  0x6c   : > { %v1051_v13 = vpack.c.bf16 %v312_v11, %v311_v10  ;;  %v281_v16 = vld [vmem:[#allocation7 + $0x10] sm:$0xff]  ;;  %1020 = vmatprep.subr.bf16.mxu0 %v1019_v8  ;;  %v1023_v17 = vpack.c.bf16 %v298_v15, %v297_v14  ;;  %v282_v18 = vld [vmem:[#allocation7 + $0x18] sm:$0xff]  ;;  %v299_v23 = vld [vmem:[#allocation7 + $0xa0] sm:$0xff]  ;;  %p1307_p11 = scmp.ne.s32.totalorder %s1664_s20, %s1306_s5  ;;  %p1735_p0 = scmp.ne.s32.totalorder %s1726_s6, 0 }
  0x6d   : > { %v229_v2 = vand.u32 15, %v1603_v1  ;;  %v1607_v3 = vadd.s32 8, %v1603_v1  ;;  %v313_v19 = vld [vmem:[#allocation7 + $0x110] sm:$0xff]  ;;  %v314_v20 = vld [vmem:[#allocation7 + $0x118] sm:$0xff]  ;;  %1022 = vmatpush3.bf16.msra.mxu0 %v1021_v12  ;;  %v1025_v21 = vpack.c.bf16 %v282_v18, %v281_v16  ;;  %v300_v24 = vld [vmem:[#allocation7 + $0xa8] sm:$0xff]  ;;  %vm262_vm0 = vcmp.lt.s32.totalorder %v1603_v1, 7 }
  0x6e   : > { %1052 = vmatprep.subr.bf16.mxu1 %v1051_v13  ;;  %v1055_v22 = vpack.c.bf16 %v314_v20, %v313_v19  ;;  %v283_v25 = vld [vmem:[#allocation7 + $0x20] sm:$0xff]  ;;  %1024 = vmatprep.subr.bf16.mxu0 %v1023_v17  ;;  %v1027_v26 = vpack.c.bf16 %v300_v24, %v299_v23  ;;  %v284_v27 = vld [vmem:[#allocation7 + $0x28] sm:$0xff]  ;;  %v301_v31 = vld [vmem:[#allocation7 + $0xb0] sm:$0xff]  ;;  %vm253_vm1 = vcmp.lt.s32.totalorder %v1603_v1, 1  ;;  %p1308_p2 = pnand %p1307_p11, %p1735_p0  ;;  %s1383_s16 = smov [#allocation10]  }
  0x6f   : > { %v236_v4 = vand.u32 15, %v1607_v3  ;;  %1054 = vmatpush3.bf16.msra.mxu1 %v1051_v13  ;;  %v315_v28 = vld [vmem:[#allocation7 + $0x120] sm:$0xff]  ;;  %v316_v29 = vld [vmem:[#allocation7 + $0x128] sm:$0xff]  ;;  %v302_v32 = vld [vmem:[#allocation7 + $0xb8] sm:$0xff]  ;;  %v1029_v35 = vpack.c.bf16 %v284_v27, %v283_v25  ;;  %vm1629_vm2 = vcmp.ne.s32.totalorder %v229_v2, 0  ;;  %s1310_s11 = sshll.u32 %s1383_s16, 4  ;;  %s1311_s11 = int_to_ptr.vmem [resolvable:$false] %s1310_s11 }
  0x70   : > { %1056 = vmatprep.subr.bf16.mxu1 %v1055_v22  ;;  %v1059_v30 = vpack.c.bf16 %v316_v29, %v315_v28  ;;  %v317_v33 = vld [vmem:[#allocation7 + $0x130] sm:$0xff]  ;;  %v318_v34 = vld [vmem:[#allocation7 + $0x138] sm:$0xff]  ;;  %v1031_v36 = vpack.c.bf16 %v302_v32, %v301_v31  ;;  %v303_v40 = vld [vmem:[#allocation7 + $0xc0] sm:$0xff]  ;;  %p1309_p3 = pneg %p1308_p2  ;;  %s1312_s25 = scalar_lea.vmem %s1311_s11, 512 }
  0x71   : > { %1026 = vmatpush3.bf16.msra.mxu0 %v1025_v21  ;;  %v285_v37 = vld [vmem:[#allocation7 + $0x30] sm:$0xff]  ;;  %v286_v38 = vld [vmem:[#allocation7 + $0x38] sm:$0xff]  ;;  %v1063_v39 = vpack.c.bf16 %v318_v34, %v317_v33  ;;  %v304_v41 = vld [vmem:[#allocation7 + $0xc8] sm:$0xff]  ;;  %vm1637_vm3 = vcmp.ne.s32.totalorder %v236_v4, 15  ;;  %p1313_p7 = scmp.lt.s32.totalorder %s1664_s20, %s1311_s11  ;;  %p1314_p9 = scmp.lt.s32.totalorder %s1312_s25, %s1306_s5 }
  0x72   : > { %1028 = vmatprep.subr.bf16.mxu0 %v1027_v26  ;;  %v319_v42 = vld [vmem:[#allocation7 + $0x140] sm:$0xff]  ;;  %v320_v43 = vld [vmem:[#allocation7 + $0x148] sm:$0xff]  ;;  %v1033_v44 = vpack.c.bf16 %v286_v38, %v285_v37  ;;  %v1035_v45 = vpack.c.bf16 %v304_v41, %v303_v40  ;;  %v305_v49 = vld [vmem:[#allocation7 + $0xd0] sm:$0xff] }
  0x73   : > { %1058 = vmatpush3.bf16.msra.mxu1 %v1055_v22  ;;  %v287_v46 = vld [vmem:[#allocation7 + $0x40] sm:$0xff]  ;;  %v288_v47 = vld [vmem:[#allocation7 + $0x48] sm:$0xff]  ;;  %v1067_v48 = vpack.c.bf16 %v320_v43, %v319_v42  ;;  %v306_v50 = vld [vmem:[#allocation7 + $0xd8] sm:$0xff]  ;;  %p1315_p12 = por %p1314_p9, %p1313_p7 }
  0x74   : > { %1060 = vmatprep.subr.bf16.mxu1 %v1059_v30  ;;  %v321_v51 = vld [vmem:[#allocation7 + $0x150] sm:$0xff]  ;;  %v322_v52 = vld [vmem:[#allocation7 + $0x158] sm:$0xff]  ;;  %v1037_v53 = vpack.c.bf16 %v288_v47, %v287_v46  ;;  %v1039_v56 = vpack.c.bf16 %v306_v50, %v305_v49  ;;  %v307_v62 = vld [vmem:[#allocation7 + $0xe0] sm:$0xff] }
  0x75   : > { %1030 = vmatpush3.bf16.msra.mxu0 %v1029_v35  ;;  %v1611_v54 = vld [vmem:[%s1593_s28] sm:$0xff]  ;;  %v1614_v55 = vld [vmem:[%s1593_s28 + $0x8] sm:$0xff]  ;;  %v1071_v61 = vpack.c.bf16 %v322_v52, %v321_v51  ;;  %p1316_p1 = pnand %p1315_p12, %p1309_p3 }
  0x76   : > { %1032 = vmatprep.subr.bf16.mxu0 %v1031_v36  ;;  %v289_v57 = vld [vmem:[#allocation7 + $0x50] sm:$0xff]  ;;  %v290_v58 = vld [vmem:[#allocation7 + $0x58] sm:$0xff]  ;;  %v260_v59 = vrot.slane %v1611_v54, 1  ;;  %v261_v60 = vrot.slane %v1614_v55, 1  ;;  %v308_v63 = vld [vmem:[#allocation7 + $0xe8] sm:$0xff]  ;;  %391 = vmatprep.mubr.f32.mxu0 %v1611_v54  ;;  %v251_v26 = vrot.slane %v1611_v54, 7 }
  0x77   : > { %1062 = vmatpush3.bf16.msra.mxu1 %v1059_v30  ;;  %v323_v0 = vld [vmem:[#allocation7 + $0x160] sm:$0xff]  ;;  %v324_v5 = vld [vmem:[#allocation7 + $0x168] sm:$0xff]  ;;  %v1041_v7 = vpack.c.bf16 %v290_v58, %v289_v57  ;;  %v1043_v8 = vpack.c.bf16 %v308_v63, %v307_v62  ;;  %v309_v12 = vld [vmem:[#allocation7 + $0xf0] sm:$0xff]  ;;  %v252_v27 = vrot.slane %v1614_v55, 7 }
  0x78   : > { %1064 = vmatprep.subr.bf16.mxu1 %v1063_v39  ;;  %v263_v6 = vsel %vm262_vm0, %v260_v59, %v261_v60  ;;  %v291_v9 = vld [vmem:[#allocation7 + $0x60] sm:$0xff]  ;;  %v292_v10 = vld [vmem:[#allocation7 + $0x68] sm:$0xff]  ;;  %v1075_v11 = vpack.c.bf16 %v324_v5, %v323_v0  ;;  %v310_v13 = vld [vmem:[#allocation7 + $0xf8] sm:$0xff]  ;;  %v264_v38 = vsel %vm262_vm0, %v261_v60, %v260_v59 }
  0x79   : > { %1034 = vmatpush3.bf16.msra.mxu0 %v1033_v44  ;;  %981 = vmatprep.mubr.f32.mxu1 %v263_v6  ;;  %v325_v14 = vld [vmem:[#allocation7 + $0x170] sm:$0xff]  ;;  %v326_v15 = vld [vmem:[#allocation7 + $0x178] sm:$0xff]  ;;  %v1045_v16 = vpack.c.bf16 %v292_v10, %v291_v9  ;;  %v1047_v17 = vpack.c.bf16 %v310_v13, %v309_v12  ;;  %v519_v21 = vld [vmem:[#allocation9 + $0x80] sm:$0xff]  ;;  %v255_v36 = vsel %vm253_vm1, %v252_v27, %v251_v26 }
  0x7a   : > { %1036 = vmatprep.subr.bf16.mxu0 %v1035_v45  ;;  %v293_v18 = vld [vmem:[#allocation7 + $0x70] sm:$0xff]  ;;  %v294_v19 = vld [vmem:[#allocation7 + $0x78] sm:$0xff]  ;;  %v1079_v20 = vpack.c.bf16 %v326_v15, %v325_v14  ;;  %v520_v22 = vld [vmem:[#allocation9 + $0x88] sm:$0xff]  ;;  %v254_v3 = vsel %vm253_vm1, %v251_v26, %v252_v27 }
  0x7b   : > { %1066 = vmatpush3.bf16.msra.mxu1 %v1063_v39  ;;  %v535_v23 = vld [vmem:[#allocation9 + $0x100] sm:$0xff]  ;;  %v536_v24 = vld [vmem:[#allocation9 + $0x108] sm:$0xff]  ;;  %v1049_v25 = vpack.c.bf16 %v294_v19, %v293_v18  ;;  %v1083_v28 = vpack.c.bf16 %v520_v22, %v519_v21  ;;  %v521_v32 = vld [vmem:[#allocation9 + $0x90] sm:$0xff] }
  0x7c   : > { %1068 = vmatprep.subr.bf16.mxu1 %v1067_v48  ;;  %v503_v29 = vld [vmem:[#allocation9] sm:$0xff]  ;;  %v504_v30 = vld [vmem:[#allocation9 + $0x8] sm:$0xff]  ;;  %v1115_v31 = vpack.c.bf16 %v536_v24, %v535_v23  ;;  %v522_v33 = vld [vmem:[#allocation9 + $0x98] sm:$0xff] }
  0x7d   : > { %1038 = vmatpush3.bf16.msra.mxu0 %v1037_v53  ;;  %v537_v34 = vld [vmem:[#allocation9 + $0x110] sm:$0xff]  ;;  %v538_v35 = vld [vmem:[#allocation9 + $0x118] sm:$0xff]  ;;  %v1085_v40 = vpack.c.bf16 %v504_v30, %v503_v29  ;;  %v1087_v41 = vpack.c.bf16 %v522_v33, %v521_v32  ;;  %v523_v44 = vld [vmem:[#allocation9 + $0xa0] sm:$0xff] }
  0x7e   : > { %1040 = vmatprep.subr.bf16.mxu0 %v1039_v56  ;;  %v505_v42 = vld [vmem:[#allocation9 + $0x10] sm:$0xff]  ;;  %v506_v43 = vld [vmem:[#allocation9 + $0x18] sm:$0xff]  ;;  %v1119_v2 = vpack.c.bf16 %v538_v35, %v537_v34  ;;  %v524_v45 = vld [vmem:[#allocation9 + $0xa8] sm:$0xff] }
  0x7f   : > { %1070 = vmatpush3.bf16.msra.mxu1 %v1067_v48  ;;  %v539_v46 = vld [vmem:[#allocation9 + $0x120] sm:$0xff]  ;;  %v540_v47 = vld [vmem:[#allocation9 + $0x128] sm:$0xff]  ;;  %v1089_v4 = vpack.c.bf16 %v506_v43, %v505_v42  ;;  %v1091_v48 = vpack.c.bf16 %v524_v45, %v523_v44  ;;  %v525_v52 = vld [vmem:[#allocation9 + $0xb0] sm:$0xff] }
  0x80   : > { %1072 = vmatprep.subr.bf16.mxu1 %v1071_v61  ;;  %v507_v49 = vld [vmem:[#allocation9 + $0x20] sm:$0xff]  ;;  %v508_v50 = vld [vmem:[#allocation9 + $0x28] sm:$0xff]  ;;  %v1123_v51 = vpack.c.bf16 %v540_v47, %v539_v46  ;;  %v526_v53 = vld [vmem:[#allocation9 + $0xb8] sm:$0xff] }
  0x81   : > { %1042 = vmatpush3.bf16.msra.mxu0 %v1041_v7  ;;  %v541_v56 = vld [vmem:[#allocation9 + $0x130] sm:$0xff]  ;;  %v542_v57 = vld [vmem:[#allocation9 + $0x138] sm:$0xff]  ;;  %v1093_v58 = vpack.c.bf16 %v508_v50, %v507_v49  ;;  %v1095_v59 = vpack.c.bf16 %v526_v53, %v525_v52  ;;  %v527_v63 = vld [vmem:[#allocation9 + $0xc0] sm:$0xff] }
  0x82   : > { %1044 = vmatprep.subr.bf16.mxu0 %v1043_v8  ;;  %v509_v60 = vld [vmem:[#allocation9 + $0x30] sm:$0xff]  ;;  %v1127_v62 = vpack.c.bf16 %v542_v57, %v541_v56  ;;  %v528_v0 = vld [vmem:[#allocation9 + $0xc8] sm:$0xff]  ;;  %v511_v7 = vld [vmem:[#allocation9 + $0x40] sm:$0xff] }
  0x83   : > { %1074 = vmatpush3.bf16.msra.mxu1 %v1071_v61  ;;  %v510_v61 = vld [vmem:[#allocation9 + $0x38] sm:$0xff]  ;;  %v1099_v6 = vpack.c.bf16 %v528_v0, %v527_v63  ;;  %v512_v8 = vld [vmem:[#allocation9 + $0x48] sm:$0xff]  ;;  %v543_v9 = vld [vmem:[#allocation9 + $0x140] sm:$0xff] }
  0x84   : > { %1076 = vmatprep.subr.bf16.mxu1 %v1075_v11  ;;  %v1097_v5 = vpack.c.bf16 %v510_v61, %v509_v60  ;;  %v1101_v10 = vpack.c.bf16 %v512_v8, %v511_v7  ;;  %v529_v13 = vld [vmem:[#allocation9 + $0xd0] sm:$0xff]  ;;  %v530_v14 = vld [vmem:[#allocation9 + $0xd8] sm:$0xff]  ;;  %v531_v22 = vld [vmem:[#allocation9 + $0xe0] sm:$0xff] }
  0x85   : > { %1046 = vmatpush3.bf16.msra.mxu0 %v1045_v16  ;;  %v1103_v15 = vpack.c.bf16 %v530_v14, %v529_v13  ;;  %v513_v16 = vld [vmem:[#allocation9 + $0x50] sm:$0xff]  ;;  %v532_v23 = vld [vmem:[#allocation9 + $0xe8] sm:$0xff]  ;;  %v547_v27 = vld [vmem:[#allocation9 + $0x160] sm:$0xff] }
  0x86   : > { %1048 = vmatprep.subr.bf16.mxu0 %v1047_v17  ;;  %v514_v17 = vld [vmem:[#allocation9 + $0x58] sm:$0xff]  ;;  %v545_v18 = vld [vmem:[#allocation9 + $0x150] sm:$0xff]  ;;  %v1107_v24 = vpack.c.bf16 %v532_v23, %v531_v22  ;;  %v516_v26 = vld [vmem:[#allocation9 + $0x68] sm:$0xff] }
  0x87   : > { %1078 = vmatpush3.bf16.msra.mxu1 %v1075_v11  ;;  %v544_v11 = vld [vmem:[#allocation9 + $0x148] sm:$0xff]  ;;  %v1105_v19 = vpack.c.bf16 %v514_v17, %v513_v16  ;;  %v534_v32 = vld [vmem:[#allocation9 + $0xf8] sm:$0xff]  ;;  %v517_v34 = vld [vmem:[#allocation9 + $0x70] sm:$0xff] }
  0x88   : > { %1080 = vmatprep.subr.bf16.mxu1 %v1079_v20  ;;  %v1131_v12 = vpack.c.bf16 %v544_v11, %v543_v9  ;;  %v548_v29 = vld [vmem:[#allocation9 + $0x168] sm:$0xff]  ;;  %v518_v35 = vld [vmem:[#allocation9 + $0x78] sm:$0xff] }
  0x89   : > { %1050 = vmatpush3.bf16.msra.mxu0 %v1049_v25  ;;  %v515_v25 = vld [vmem:[#allocation9 + $0x60] sm:$0xff]  ;;  %v1139_v30 = vpack.c.bf16 %v548_v29, %v547_v27 }
  0x8a   : > { %1084 = vmatprep.subr.bf16.mxu0 %v1083_v28  ;;  %v1109_v28 = vpack.c.bf16 %v516_v26, %v515_v25 }
  0x8b   : > { %1082 = vmatpush3.bf16.msra.mxu1 %v1079_v20  ;;  %v546_v20 = vld [vmem:[#allocation9 + $0x158] sm:$0xff] }
  0x8c   : > { %1116 = vmatprep.subr.bf16.mxu1 %v1115_v31  ;;  %830 = vmatmul.mubr.msk.f32.vlgmr.msra.gmra.mrb[0].mxu0 %vm1629_vm2, %v255_v36  ;;  %v1135_v21 = vpack.c.bf16 %v546_v20, %v545_v18  ;;  %v549_v36 = vld [vmem:[#allocation9 + $0x170] sm:$0xff] }
  0x8d   : > { %396 = vmatprep.mubr.f32.mxu0 %v1614_v55  ;;  %1086 = vmatpush3.bf16.msra.mxu0 %v1085_v40  ;;  %v550_v40 = vld [vmem:[#allocation9 + $0x178] sm:$0xff] }
  0x8e   : > { %982 = vmatmul.mubr.msk.f32.vlgmr.msra.gmra.mrb[0].mxu1 %vm1637_vm3, %v264_v38  ;;  %1088 = vmatprep.subr.bf16.mxu0 %v1087_v41  ;;  %v1113_v38 = vpack.c.bf16 %v518_v35, %v517_v34  ;;  %v1143_v41 = vpack.c.bf16 %v550_v40, %v549_v36 }
  0x8f   : > { %1118 = vmatpush3.bf16.msra.mxu1 %v1115_v31  ;;  %v533_v31 = vld [vmem:[#allocation9 + $0xf0] sm:$0xff] }
  0x90   : > { %1120 = vmatprep.subr.bf16.mxu1 %v1119_v2  ;;  %397 = vmatmul.mubr.f32.gmra.mrb[2].mxu0 %v254_v3  ;;  %v1111_v33 = vpack.c.bf16 %v534_v32, %v533_v31 }
  0x91   : > { %1090 = vmatpush3.bf16.msra.mxu0 %v1089_v4 }
  0x92   : > { %1092 = vmatprep.subr.bf16.mxu0 %v1091_v48 }
  0x93   : > { %1122 = vmatpush3.bf16.msra.mxu1 %v1119_v2 }
  0x94   : > { %1124 = vmatprep.subr.bf16.mxu1 %v1123_v51 }
  0x95   : > { %1094 = vmatpush3.bf16.msra.mxu0 %v1093_v58 }
  0x96   : > { %1096 = vmatprep.subr.bf16.mxu0 %v1095_v59 }
  0x97   : > { %1126 = vmatpush3.bf16.msra.mxu1 %v1123_v51 }
  0x98   : > { %1128 = vmatprep.subr.bf16.mxu1 %v1127_v62 }
  0x99   : > { %1098 = vmatpush3.bf16.msra.mxu0 %v1097_v5 }
  0x9a   : > { %1100 = vmatprep.subr.bf16.mxu0 %v1099_v6 }
  0x9b   : > { %1130 = vmatpush3.bf16.msra.mxu1 %v1127_v62 }
  0x9c   : > { %1132 = vmatprep.subr.bf16.mxu1 %v1131_v12 }
  0x9d   : > { %1102 = vmatpush3.bf16.msra.mxu0 %v1101_v10 }
  0x9e   : > { %1104 = vmatprep.subr.bf16.mxu0 %v1103_v15 }
  0x9f   : > { %1134 = vmatpush3.bf16.msra.mxu1 %v1131_v12 }
  0xa0   : > { %1136 = vmatprep.subr.bf16.mxu1 %v1135_v21 }
  0xa1   : > { %1106 = vmatpush3.bf16.msra.mxu0 %v1105_v19 }
  0xa2   : > { %1108 = vmatprep.subr.bf16.mxu0 %v1107_v24 }
  0xa3   : > { %1138 = vmatpush3.bf16.msra.mxu1 %v1135_v21 }
  0xa4   : > { %1140 = vmatprep.subr.bf16.mxu1 %v1139_v30 }
  0xa5   : > { %1110 = vmatpush3.bf16.msra.mxu0 %v1109_v28 }
  0xa6   : > { %1112 = vmatprep.subr.bf16.mxu0 %v1111_v33 }
  0xa7   : > { %1142 = vmatpush3.bf16.msra.mxu1 %v1139_v30 }
  0xa8   : > { %1144 = vmatprep.subr.bf16.mxu1 %v1143_v41 }
  0xa9   : > { %1114 = vmatpush3.bf16.msra.mxu0 %v1113_v38 }
  0xab   : > { %1146 = vmatpush3.bf16.msra.mxu1 %v1143_v41 }
 0x15f   : > { %v869_v42 = vpop.f32.mrb[0].mxu0 }
 0x160   : > { %v870_v43 = vpop.f32.mrb[1].mxu0 }
 0x161   : > { %v983_v2 = vpop.f32.mrb[0].mxu1  ;;  %v871_v44 = vadd.f32 %v870_v43, %v869_v42 }
 0x162   : > { %v468_v45 = vpop.f32.mrb[1].mxu1 }
 0x163   : > { %v469_v46 = vadd.f32 %v871_v44, %v468_v45  ;;  %v872_v47 = vpop.f32.mrb[2].mxu0 }
 0x164   : > { %v873_v3 = vpop.f32.mrb[3].mxu0 }
 0x165   : > { %v477_v4 = vmax.f32 %v469_v46, 0.0  ;;  %v874_v48 = vadd.f32 %v873_v3, %v872_v47 }
 0x167   : > { %v474_v49 = vadd.f32 %v983_v2, %v874_v48  ;;  %615 = vmatprep.mubr.f32.mxu0 %v477_v4  ;;  %v479_v51 = vrot.slane %v477_v4, 7  ;;  %v485_v52 = vrot.slane %v477_v4, 1 }
 0x169   : > { %v478_v50 = vmax.f32 %v474_v49, 0.0 }
 0x16b   : > { %v480_v53 = vrot.slane %v478_v50, 7  ;;  %v486_v56 = vrot.slane %v478_v50, 1 }
 0x16d   : > { %v482_v57 = vsel %vm253_vm1, %v480_v53, %v479_v51  ;;  %v487_v58 = vsel %vm262_vm0, %v485_v52, %v486_v56  ;;  %v488_v59 = vsel %vm262_vm0, %v486_v56, %v485_v52  ;;  %v481_v60 = vsel %vm253_vm1, %v479_v51, %v480_v53 }
 0x16e   : > { %834 = vmatmul.mubr.msk.f32.vlgmr.msra.gmra.mrb[4].mxu0 %vm1629_vm2, %v482_v57  ;;  %1016 = vmatprep.mubr.f32.mxu1 %v487_v58 }
 0x16f   : > { %620 = vmatprep.mubr.f32.mxu0 %v478_v50  ;;  %1017 = vmatmul.mubr.msk.f32.vlgmr.msra.gmra.mrb[2].mxu1 %vm1637_vm3, %v488_v59 }
 0x172   : > { %621 = vmatmul.mubr.f32.gmra.mrb[6].mxu0 %v481_v60 }
 0x241   : > { %v925_v61 = vpop.f32.mrb[4].mxu0 }
 0x242   : > { %v926_v62 = vpop.f32.mrb[5].mxu0  ;;  %v1018_v63 = vpop.f32.mrb[2].mxu1 }
 0x243   : > { %v927_v0 = vadd.f32 %v926_v62, %v925_v61  ;;  %v692_v5 = vpop.f32.mrb[3].mxu1 }
 0x245   : > { %v618_v6 = vadd.f32 %v927_v0, %v1611_v54  ;;  %v928_v1 = vpop.f32.mrb[6].mxu0 }
 0x246   : > { %v929_v37 = vpop.f32.mrb[7].mxu0 }
 0x247   : > { %v693_v7 = vadd.f32 %v692_v5, %v618_v6  ;;  %v930_v8 = vadd.f32 %v929_v37, %v928_v1 }
 0x249   : > { %701 = vst [vmem:[%s217_s18] sm:$0xff] %v693_v7  ;;  %v623_v39 = vadd.f32 %v930_v8, %v1614_v55 }
 0x24b   : > { %v698_v54 = vadd.f32 %v1018_v63, %v623_v39 }
 0x24d   : > { %702 = vst [vmem:[%s217_s18 + $0x8] sm:$0xff] %v698_v54 }
 0x24e   : > { %1319 = shalt.err (!%p1316_p1)
}
 0x24f   : > { %s1320_s10 = scalar_lea.hbm %s1670_s27, 256  ;;  %s1324_s26 = scalar_lea.hbm %s1717_s3, 512 }
 0x250   : > { %p1321_p13 = scmp.ne.s32.totalorder %s1670_s27, %s1320_s10  ;;  %p1325_p4 = scmp.lt.u32.totalorder %s1670_s27, %s1717_s3 }
 0x251   : > { %p1326_p5 = scmp.lt.u32.totalorder %s1324_s26, %s1320_s10  ;;  %p1328_p11 = scmp.lt.u32.totalorder %s1320_s10, %s1670_s27 }
 0x252   : > { %p1322_p6 = pnand %p1321_p13, %p1735_p0 }
 0x253   : > { %p1327_p8 = por %p1326_p5, %p1325_p4 }
 0x254   : > { %p1323_p10 = pneg %p1322_p6 }
 0x255   : > { %p1329_p2 = por %p1328_p11, %p1327_p8 }
 0x257   : > { %p1330_p3 = pnand %p1329_p2, %p1323_p10 }
 0x259   : > { %1333 = shalt.err (!%p1330_p3)
}
 0x25a   : > { %s1384_s28 = smov 128   ;;  %s1385_s18 = smov 8  }
 0x25b   : > { %1157 = dma.vmem_to_hbm [thread:$0]  (%p1735_p0), %s1664_s20, 256, %s1670_s27, %s704_s22, %s1384_s28, %s1384_s28, %s1385_s18  }
 0x25c PF: > { %s732_s7 = sand.u32 1, %s1364_s12   ;;  %p1736_p7 = scmp.ne.s32.totalorder %s1722_s19, 0 }
 0x25d   : > { %p1737_p9 = scmp.ge.s32.totalorder %s1376_s15, 2  ;;  %s733_s8 = scalar_lea.sflag [#allocation6], %s732_s7 }
 0x25f   : > { %p1171_p12 = pnand %p1737_p9, %p1736_p7 }
 0x261   : > { %1359 = dma.done.wait (!%p1171_p12), %s733_s8, 256  }
 0x262   : > { %1361 = vsyncadd (!%p1171_p12), %s733_s8, 4294967040  ;;  %p17_p1 = scmp.ge.s32.totalorder %s1522_s23, 4   ;;  %s1738_s12 = smov %s1368_s13 }
 0x263   : > { %s1739_s13 = smov %s1372_s14  ;;  %s1740_s14 = smov %s1538_s9 }
 0x264   : > { %s1741_s15 = smov %s1522_s23  ;;  %19 = sbr.rel (!%p17_p1) target bundleno = 6 (0x6), region = 85 }
 0x26b   :  { %738 = vsyncpa [#allocation5], 1 }
 0x26c   :  { %740 = vsyncpa [#allocation5 + $0x1], 1 }
 0x26d   :  { %741 = vsyncpa [#allocation8], 1 }
 0x26e   :  { %742 = vsyncpa [#allocation6], 1 }
 0x26f   :  { %744 = vsyncpa [#allocation6 + $0x1], 1 }

</bundles_post_ra>
